<compile_context>
chip_gen: v7x
topology: tpu7x:2x2x1
jax: 0.10.0
libtpu: 0.0.40
codegen_flags: <defaults>
</compile_context>

<pallas_src>
import math

import numpy as np
import jax
import jax.numpy as jnp
from jax.experimental import pallas as pl
from jax.experimental.pallas import tpu as pltpu


_LANES = 128                        # TPU vreg lane width
_TARGET_OUT_TILE_BYTES = 4 << 20    # per-output-tile budget (x2 for double buffering)
_MEGACORE_MIN_BYTES = 1 << 20       # split rows into >=2 grid steps above this (v7x)


def _round_up(x: int, m: int) -> int:
    return (x + m - 1) // m * m


# --------------------------------------------------------------------------- #
# Kernels
# --------------------------------------------------------------------------- #

def _bcast_kernel(t_ref, fp_ref, out_ref):
    """out[r, j] = sin(t[r] * fp[0, j] + fp[1, j]).

    t_ref:   (tile_r, 1)  timesteps in their original dtype (cast to f32 here)
    fp_ref:  (2, C)       row 0 = scale*freq per lane, row 1 = phase per lane
    out_ref: (tile_r, C)
    """
    t = t_ref[...].astype(jnp.float32)
    fp = fp_ref[...]
    arg = t * fp[0:1, :] + fp[1:2, :]
    # NOTE: sin lowers to VPU range-reduction + polynomial (~15 VALU ops/elem),
    # not a single EUP pass — the kernel is VALU-slot bound for f32 outputs.
    out_ref[...] = jnp.sin(arg).astype(out_ref.dtype)


def _packed_kernel(t_ref, fp_ref, out_ref):
    """Lane-packed variant for dim < 128 with 128 % dim == 0.

    The row-major (n, dim) output is produced as (n // k, 128) with k = 128 // dim
    original rows per packed 128-lane row, so every store is dense/unmasked.

    t_ref:   (tile_r, k)   the k consecutive timesteps covered by each packed row
    fp_ref:  (k + 1, 128)  rows 0..k-1: freqs masked to the lanes of sub-row j
                           row  k     : phase per lane
    out_ref: (tile_r, 128)
    """
    k = t_ref.shape[-1]
    t = t_ref[...].astype(jnp.float32)
    fp = fp_ref[...]
    # Unrolled outer-product accumulation on the VPU. For each lane exactly one
    # fp row is non-zero, so this is numerically identical (in f32) to the plain
    # t * freq + phase — no MXU / matmul-precision concerns.
    arg = fp[k:k + 1, :]
    for j in range(k):
        arg = arg + t[:, j:j + 1] * fp[j:j + 1, :]
    out_ref[...] = jnp.sin(arg).astype(out_ref.dtype)


# --------------------------------------------------------------------------- #
# Module wrapper
# --------------------------------------------------------------------------- #

class TimestepsPallas:
    """JAX/Pallas equivalent of the PyTorch `Timesteps` module.

    out_dtype defaults to float32 to match the reference semantics; pass
    jnp.bfloat16 when feeding a bf16 MLP (halves HBM store bytes — the big win
    on v5e's ~820 GB/s HBM; compute stays f32, the cast happens at the store).
    """

    def __init__(self, num_channels: int, flip_sin_to_cos: bool,
                 downscale_freq_shift: float, scale: float = 1.0,
                 max_period: int = 10000, out_dtype=jnp.float32):
        self.num_channels = num_channels
        self.flip_sin_to_cos = flip_sin_to_cos
        self.downscale_freq_shift = downscale_freq_shift
        self.scale = scale
        self.max_period = max_period
        self.out_dtype = out_dtype

        half = num_channels // 2
        assert half > 0, "num_channels must be >= 2"
        assert float(half) != float(downscale_freq_shift), \
            "half_dim == downscale_freq_shift would divide by zero"

        # Compile-time constants (float32, matching the reference math).
        exponent = (-np.float32(math.log(max_period))
                    * np.arange(half, dtype=np.float32)
                    / np.float32(half - downscale_freq_shift))
        base = (np.float32(scale) * np.exp(exponent)).astype(np.float32)  # (half,)

        zeros = np.zeros(half, np.float32)
        halfpi = np.full(half, np.float32(np.pi / 2.0), np.float32)
        freqs = np.concatenate([base, base])
        if flip_sin_to_cos:
            phase = np.concatenate([halfpi, zeros])   # output layout [cos | sin]
        else:
            phase = np.concatenate([zeros, halfpi])   # output layout [sin | cos]
        if num_channels % 2 == 1:
            # padded column: sin(0 * t + 0) == 0 -> zero column produced in-kernel
            freqs = np.concatenate([freqs, np.zeros(1, np.float32)])
            phase = np.concatenate([phase, np.zeros(1, np.float32)])

        # Single resident (2, dim) operand for the broadcast kernel.
        self._fp_bcast = jnp.asarray(np.stack([freqs, phase], axis=0))

        # Lane-packing constants when dim divides the 128-lane vreg width.
        self._pack_k = 0
        self._fp_packed = None
        d = num_channels
        if 8 <= d < _LANES and _LANES % d == 0:
            k = _LANES // d
            fmask = np.zeros((k, _LANES), np.float32)
            for j in range(k):
                fmask[j, j * d:(j + 1) * d] = freqs
            ptiled = np.tile(phase, k)[None, :]                       # (1, 128)
            self._pack_k = k
            self._fp_packed = jnp.asarray(np.concatenate([fmask, ptiled], axis=0))

    def __call__(self, timesteps: jax.Array) -> jax.Array:
        assert timesteps.ndim == 1, "Timesteps should be a 1d-array"
        n = timesteps.shape[0]
        dim = self.num_channels
        out_dtype = self.out_dtype

        use_packed = (self._pack_k > 0) and (n > 0) and (n % self._pack_k == 0)
        if use_packed:
            k = self._pack_k
            rows, cols = n // k, _LANES
            t2d = timesteps.reshape(rows, k)          # original dtype; cast in-kernel
            fp = self._fp_packed
            kernel = _packed_kernel
        else:
            rows, cols = n, dim
            t2d = timesteps.reshape(n, 1)
            fp = self._fp_bcast
            kernel = _bcast_kernel

        out_itemsize = jnp.dtype(out_dtype).itemsize
        t_itemsize = jnp.dtype(t2d.dtype).itemsize

        # VMEM-budgeted row tile: multiple of 8 sublanes, or the full extent.
        rows_budget = max(8, (_TARGET_OUT_TILE_BYTES // (cols * out_itemsize)) // 8 * 8)
        tile_r = min(rows, rows_budget)
        # v7x megacore: keep >= 2 grid steps when there is enough work so the
        # "parallel" row axis actually shards across both TensorCores.
        if (tile_r == rows and rows >= 16
                and rows * cols * out_itemsize > _MEGACORE_MIN_BYTES):
            tile_r = min(rows, _round_up(pl.cdiv(rows, 2), 8))
        grid = (pl.cdiv(rows, tile_r),)

        # Double-buffered output + input tiles + resident constant + margin.
        vmem_need = (2 * tile_r * cols * out_itemsize
                     + 2 * tile_r * t2d.shape[1] * t_itemsize
                     + int(fp.size) * 4 + (1 << 20))
        vmem_limit = int(min(max(vmem_need, 16 << 20), 32 << 20))

        # Advisory cost: sin is VALU range-reduction + polynomial on TPU, so it is
        # reported as flops (no true transcendentals). Bytes track the actual dtypes.
        n_elem = rows * cols
        cost = pl.CostEstimate(
            flops=18 * n_elem,
            transcendentals=0,
            bytes_accessed=int(n_elem * out_itemsize
                               + t2d.size * t_itemsize + int(fp.size) * 4),
        )

        emb = pl.pallas_call(
            kernel,
            out_shape=jax.ShapeDtypeStruct((rows, cols), out_dtype),
            grid=grid,
            in_specs=[
                pl.BlockSpec((tile_r, t2d.shape[1]), lambda i: (i, 0)),
                pl.BlockSpec(fp.shape, lambda i: (0, 0)),   # resident constant
            ],
            out_specs=pl.BlockSpec((tile_r, cols), lambda i: (i, 0)),
            compiler_params=pltpu.CompilerParams(
                dimension_semantics=("parallel",),
                vmem_limit_bytes=vmem_limit,
            ),
            cost_estimate=cost,
        )(t2d, fp)

        if use_packed:
            # Row-major (rows, 128) is the same contiguous data as (n, dim):
            # reshape is a metadata-only view, no extra HBM pass.
            emb = emb.reshape(n, dim)
        return emb


# --------------------------------------------------------------------------- #
# Pure-JAX reference (ground truth port of the PyTorch get_timestep_embedding)
# --------------------------------------------------------------------------- #

def _reference(timesteps, embedding_dim, flip_sin_to_cos, downscale_freq_shift,
               scale=1.0, max_period=10000):
    half_dim = embedding_dim // 2
    exponent = -math.log(max_period) * jnp.arange(half_dim, dtype=jnp.float32)
    exponent = exponent / (half_dim - downscale_freq_shift)
    freqs = jnp.exp(exponent)
    emb = timesteps.astype(jnp.float32)[:, None] * freqs[None, :]
    emb = scale * emb
    emb = jnp.concatenate([jnp.sin(emb), jnp.cos(emb)], axis=-1)
    if flip_sin_to_cos:
        emb = jnp.concatenate([emb[:, half_dim:], emb[:, :half_dim]], axis=-1)
    if embedding_dim % 2 == 1:
        emb = jnp.pad(emb, ((0, 0), (0, 1)))
    return emb


if __name__ == "__main__":
    key = jax.random.PRNGKey(0)
    key_t, key_i = jax.random.split(key)

    batch = 8
    timesteps = jax.random.uniform(key_t, (batch,), jnp.float32,
                                   minval=0.0, maxval=1000.0)

    # Config 1: power-of-two channels (lane-packed path), flip_sin_to_cos=True.
    mod = TimestepsPallas(32, flip_sin_to_cos=True, downscale_freq_shift=1.0)
    out = jax.block_until_ready(mod(timesteps))
    ref = _reference(timesteps, 32, True, 1.0)
    assert out.shape == (batch, 32), out.shape
    assert out.dtype == jnp.float32
    assert jnp.allclose(out, ref, atol=2e-4, rtol=1e-4), \
        float(jnp.max(jnp.abs(out - ref)))

    # Config 2: odd channels, no flip (broadcast path + in-kernel zero pad column).
    mod2 = TimestepsPallas(33, flip_sin_to_cos=False, downscale_freq_shift=0.0)
    out2 = jax.block_until_ready(mod2(timesteps))
    ref2 = _reference(timesteps, 33, False, 0.0)
    assert out2.shape == (batch, 33), out2.shape
    assert jnp.allclose(out2, ref2, atol=2e-4, rtol=1e-4), \
        float(jnp.max(jnp.abs(out2 - ref2)))

    # Config 3: integer timesteps (cast happens in-kernel), dim=64 packed path.
    t_int = jax.random.randint(key_i, (batch,), 0, 1000, jnp.int32)
    mod3 = TimestepsPallas(64, flip_sin_to_cos=True, downscale_freq_shift=1.0)
    out3 = jax.block_until_ready(mod3(t_int))
    ref3 = _reference(t_int, 64, True, 1.0)
    assert out3.shape == (batch, 64), out3.shape
    assert jnp.allclose(out3, ref3, atol=2e-4, rtol=1e-4), \
        float(jnp.max(jnp.abs(out3 - ref3)))

    print("KERNEL_OK")
</pallas_src>

<mosaic_0001>
module attributes {stable_mosaic.version = 11 : i64} {
  func.func @_packed_kernel(%arg0: i32, %arg1: memref<2x4xf32, #tpu.memory_space<vmem>>, %arg2: memref<5x128xf32, #tpu.memory_space<vmem>>, %arg3: memref<2x128xf32, #tpu.memory_space<vmem>>) attributes {dimension_semantics = [#tpu.dimension_semantics<parallel>], iteration_bounds = array<i64: 1>, scalar_prefetch = 0 : i64, scratch_operands = 0 : i64, tpu.core_type = #tpu.core_type<tc>, window_params = [{transform_indices = @transform_0, window_bounds = array<i64: 2, 4>}, {pipeline_mode = #tpu.pipeline_mode<synchronous>, transform_indices = @transform_1, window_bounds = array<i64: 5, 128>}, {transform_indices = @transform_2, window_bounds = array<i64: 2, 128>}]} {
    %c0 = arith.constant 0 : index
    %c0_0 = arith.constant 0 : index
    %0 = vector.load %arg1[%c0, %c0_0] : memref<2x4xf32, #tpu.memory_space<vmem>>, vector<2x4xf32>
    %c0_1 = arith.constant 0 : index
    %c0_2 = arith.constant 0 : index
    %1 = vector.load %arg2[%c0_1, %c0_2] : memref<5x128xf32, #tpu.memory_space<vmem>>, vector<5x128xf32>
    %2 = vector.extract_strided_slice %1 {offsets = [4, 0], sizes = [1, 128], strides = [1, 1]} : vector<5x128xf32> to vector<1x128xf32>
    %3 = vector.extract_strided_slice %0 {offsets = [0, 0], sizes = [2, 1], strides = [1, 1]} : vector<2x4xf32> to vector<2x1xf32>
    %4 = vector.extract_strided_slice %1 {offsets = [0, 0], sizes = [1, 128], strides = [1, 1]} : vector<5x128xf32> to vector<1x128xf32>
    %5 = vector.broadcast %3 : vector<2x1xf32> to vector<2x128xf32>
    %6 = vector.broadcast %4 : vector<1x128xf32> to vector<2x128xf32>
    %7 = arith.mulf %5, %6 : vector<2x128xf32>
    %8 = vector.broadcast %2 : vector<1x128xf32> to vector<2x128xf32>
    %9 = arith.addf %8, %7 : vector<2x128xf32>
    %10 = vector.extract_strided_slice %0 {offsets = [0, 1], sizes = [2, 1], strides = [1, 1]} : vector<2x4xf32> to vector<2x1xf32>
    %11 = vector.extract_strided_slice %1 {offsets = [1, 0], sizes = [1, 128], strides = [1, 1]} : vector<5x128xf32> to vector<1x128xf32>
    %12 = vector.broadcast %10 : vector<2x1xf32> to vector<2x128xf32>
    %13 = vector.broadcast %11 : vector<1x128xf32> to vector<2x128xf32>
    %14 = arith.mulf %12, %13 : vector<2x128xf32>
    %15 = arith.addf %9, %14 : vector<2x128xf32>
    %16 = vector.extract_strided_slice %0 {offsets = [0, 2], sizes = [2, 1], strides = [1, 1]} : vector<2x4xf32> to vector<2x1xf32>
    %17 = vector.extract_strided_slice %1 {offsets = [2, 0], sizes = [1, 128], strides = [1, 1]} : vector<5x128xf32> to vector<1x128xf32>
    %18 = vector.broadcast %16 : vector<2x1xf32> to vector<2x128xf32>
    %19 = vector.broadcast %17 : vector<1x128xf32> to vector<2x128xf32>
    %20 = arith.mulf %18, %19 : vector<2x128xf32>
    %21 = arith.addf %15, %20 : vector<2x128xf32>
    %22 = vector.extract_strided_slice %0 {offsets = [0, 3], sizes = [2, 1], strides = [1, 1]} : vector<2x4xf32> to vector<2x1xf32>
    %23 = vector.extract_strided_slice %1 {offsets = [3, 0], sizes = [1, 128], strides = [1, 1]} : vector<5x128xf32> to vector<1x128xf32>
    %24 = vector.broadcast %22 : vector<2x1xf32> to vector<2x128xf32>
    %25 = vector.broadcast %23 : vector<1x128xf32> to vector<2x128xf32>
    %26 = arith.mulf %24, %25 : vector<2x128xf32>
    %27 = arith.addf %21, %26 : vector<2x128xf32>
    %28 = math.sin %27 : vector<2x128xf32>
    %c0_3 = arith.constant 0 : index
    %c0_4 = arith.constant 0 : index
    %29 = vector.load %arg3[%c0_3, %c0_4] : memref<2x128xf32, #tpu.memory_space<vmem>>, vector<2x128xf32>
    tpu.vector_store %arg3[%c0_3, %c0_4], %28 {strides = array<i32>} : memref<2x128xf32, #tpu.memory_space<vmem>>, vector<2x128xf32>,
    return
  }
  func.func @transform_0(%arg0: i32) -> (i32, i32) {
    %c0_i32 = arith.constant 0 : i32
    %c0_i32_0 = arith.constant 0 : i32
    return %arg0, %c0_i32 : i32, i32
  }
  func.func @transform_1(%arg0: i32) -> (i32, i32) {
    %c0_i32 = arith.constant 0 : i32
    %c0_i32_0 = arith.constant 0 : i32
    %c0_i32_1 = arith.constant 0 : i32
    return %c0_i32, %c0_i32_0 : i32, i32
  }
  func.func @transform_2(%arg0: i32) -> (i32, i32) {
    %c0_i32 = arith.constant 0 : i32
    %c0_i32_0 = arith.constant 0 : i32
    return %arg0, %c0_i32 : i32, i32
  }
}

</mosaic_0001>

<bundles_post_ra>
// kernel: tpu_custom_call.1
= control target key start
LH: loop header
LB: loop body
LE: loop exit
PB: predicated region body
PF: predicated region fallthrough
CT: control target
= control target key end

     0   :  { %7 = vsyncpa [#allocation3], 0  ;;  %s391_s0 = inlined_call_operand.hbm [shape: f32[2,4], index: 0, kind: input, shape index: {}]   ;;  %s392_s1 = inlined_call_operand.hbm [shape: f32[5,128], index: 1, kind: input, shape index: {}]   ;;  %s393_s2 = inlined_call_operand.hbm [shape: f32[2,128], index: 2, kind: output, shape index: {}]  }
   0x1   :  { %8 = vsyncpa [#allocation6], 0 }
   0x2   :  { %9 = vsyncpa [#allocation4], 0  ;;  %s306_s9 = smov [#allocation2]   ;;  %s307_s11 = smov [#allocation5]  }
   0x3   :  { %s16_s10 = sshll.u32 %s306_s9, 4  ;;  %s26_s12 = sshll.u32 %s307_s11, 4  ;;  %s17_s10 = int_to_ptr.vmem [resolvable:$true] %s16_s10  ;;  %s27_s12 = int_to_ptr.vmem [resolvable:$true] %s26_s12 }
   0x4   :  { %s234_s15 = scalar_lea.hbm %s391_s0, 32 }
   0x5   :  { %p235_p0 = scmp.ne.s32.totalorder %s391_s0, %s234_s15  ;;  %p238_p1 = scmp.lt.u32.totalorder %s234_s15, %s391_s0 }
   0x7   :  { %p240_p2 = pnand %p238_p1, %p235_p0 }
   0x9   :  { %243 = shalt.err (!%p240_p2)
}
   0xa   :  { %s244_s20 = scalar_lea.vmem %s17_s10, 32  ;;  %p249_p4 = scmp.lt.s32.totalorder %s17_s10, %s17_s10 }
   0xb   :  { %p245_p3 = scmp.ne.s32.totalorder %s17_s10, %s244_s20  ;;  %p250_p5 = scmp.lt.s32.totalorder %s244_s20, %s244_s20 }
   0xd   :  { %p251_p6 = por %p250_p5, %p249_p4 }
   0xf   :  { %p252_p7 = pnand %p251_p6, %p245_p3 }
  0x11   :  { %255 = shalt.err (!%p252_p7)
}
  0x12   :  { %19 = dma.hbm_to_vmem [thread:$0]  %s391_s0, 32, %s17_s10, [#allocation3]  }
  0x13   :  { %s256_s25 = scalar_lea.hbm %s392_s1, 128 }
  0x14   :  { %p257_p8 = scmp.ne.s32.totalorder %s392_s1, %s256_s25  ;;  %p260_p9 = scmp.lt.u32.totalorder %s256_s25, %s392_s1 }
  0x16   :  { %p262_p10 = pnand %p260_p9, %p257_p8 }
  0x18   :  { %265 = shalt.err (!%p262_p10)
}
  0x19   :  { %s266_s30 = scalar_lea.vmem %s27_s12, 128  ;;  %p271_p12 = scmp.lt.s32.totalorder %s27_s12, %s27_s12 }
  0x1a   :  { %p267_p11 = scmp.ne.s32.totalorder %s27_s12, %s266_s30  ;;  %p272_p13 = scmp.lt.s32.totalorder %s266_s30, %s266_s30 }
  0x1c   :  { %p273_p0 = por %p272_p13, %p271_p12 }
  0x1e   :  { %p274_p1 = pnand %p273_p0, %p267_p11 }
  0x20   :  { %277 = shalt.err (!%p274_p1)
}
  0x21   :  { %29 = dma.hbm_to_vmem [thread:$0]  %s392_s1, 128, %s27_s12, [#allocation6]  }
  0x22   :  { %300 = dma.done.wait [#allocation3], 32  }
  0x23   :  { %301 = vsyncadd [#allocation3], 4294967264 }
  0x24   :  { %302 = dma.done.wait [#allocation6], 128  }
  0x25   :  { %303 = vsyncadd [#allocation6], 4294967168  ;;  %v308_v0 = vmov 0   ;;  %v309_v1 = vmov 2   ;;  %v36_v2 = vld [vmem:[#allocation2] sm:$0x3]  ;;  %v43_v5 = vlaneseq }
  0x26   :  { %225 = vset.pattern.permute.xlu0 %v308_v0  ;;  %227 = vset.pattern.permute.xlu1 %v309_v1  ;;  %v310_v3 = vmov 1   ;;  %v311_v4 = vmov 3   ;;  %v37_v8 = vld [vmem:[#allocation5] sm:$0x1f]  ;;  %v312_v41 = vmov 2102212464  }
  0x27   :  { %40 = vperm.xlu0 %225, %v36_v2   ;;  %64 = vperm.xlu1 %227, %v36_v2   ;;  %v44_v6 = vshrl.u32 %v43_v5, 7  ;;  %v313_v43 = vmov 920167782   ;;  %v314_v47 = vmov 1326507024   ;;  %s318_s1 = smov [#allocation7]  }
  0x28   :  { %v315_v49 = vmov 683565275   ;;  %v316_v51 = vmov 2475754826   ;;  %v317_v54 = vmov 2131351028  }
  0x29   :  { %v45_v7 = vsub.s32 0, %v44_v6  ;;  %v50_v10 = vsub.s32 4, %v44_v6  ;;  %v59_v11 = vsub.s32 1, %v44_v6  ;;  %v69_v13 = vsub.s32 2, %v44_v6  ;;  %s194_s4 = sshll.u32 %s318_s1, 4  ;;  %s195_s4 = int_to_ptr.vmem [resolvable:$true] %s194_s4 }
  0x2a   :  { %v79_v15 = vsub.s32 3, %v44_v6  ;;  %s278_s5 = scalar_lea.vmem %s195_s4, 32  ;;  %p283_p3 = scmp.lt.s32.totalorder %s195_s4, %s195_s4 }
  0x2b   :  { %226 = vset.pattern.permute.xlu0 %v310_v3  ;;  %228 = vset.pattern.permute.xlu1 %v311_v4  ;;  %v46_v9 = vrot.slane %v37_v8, %v45_v7  ;;  %v51_v16 = vrot.slane %v37_v8, %v50_v10  ;;  %v60_v18 = vrot.slane %v37_v8, %v59_v11  ;;  %p279_p2 = scmp.ne.s32.totalorder %s195_s4, %s278_s5  ;;  %p284_p4 = scmp.lt.s32.totalorder %s278_s5, %s278_s5 }
  0x2c   :  { %54 = vperm.xlu0 %226, %v36_v2   ;;  %74 = vperm.xlu1 %228, %v36_v2   ;;  %v70_v19 = vrot.slane %v37_v8, %v69_v13  ;;  %v80_v20 = vrot.slane %v37_v8, %v79_v15 }
  0x2d   :  { %p285_p5 = por %p284_p4, %p283_p3 }
  0x2f   :  { %p286_p6 = pnand %p285_p5, %p279_p2 }
  0x30   :  { %229 = vset.pattern.permute.xlu0 %v311_v4 }
  0xa6   :  { %v41_v12 = vpop.permute.xlu0 %40  ;;  %v65_v14 = vpop.permute.xlu1 %64 }
  0xa7   :  { %v47_v17 = vmul.f32 %v46_v9, %v41_v12  ;;  %v71_v25 = vmul.f32 %v70_v19, %v65_v14 }
  0xa9   :  { %v52_v23 = vadd.f32 %v51_v16, %v47_v17 }
  0xab   :  { %v55_v21 = vpop.permute.xlu0 %54  ;;  %v75_v22 = vpop.permute.xlu1 %74 }
  0xac   :  { %v61_v24 = vmul.f32 %v60_v18, %v55_v21  ;;  %v81_v27 = vmul.f32 %v80_v20, %v75_v22 }
  0xae   :  { %v62_v26 = vadd.f32 %v61_v24, %v52_v23 }
  0xb0   :  { %v72_v28 = vadd.f32 %v71_v25, %v62_v26 }
  0xb2   :  { %v358_v29 = vadd.f32 %v81_v27, %v72_v28 }
  0xb4   :  { %v86_v30 = vand.u32 2139095040, %v358_v29  ;;  %v83_v31 = vand.u32 2147483647, %v358_v29  ;;  %vm85_vm7 = vcmp.lt.s32.totalorder %v358_v29, 0  ;;  %vm175_vm12 = vweird.f32 %v358_v29 }
  0xb6   :  { %v87_v32 = vshrl.u32 %v86_v30, 23  ;;  %v90_v34 = vand.u32 8388607, %v83_v31  ;;  %vm84_vm8 = vcmp.le.f32.partialorder %v83_v31, 0.7853982 }
  0xb8   :  { %v204_v33 = vadd.s32 4294967169, %v87_v32  ;;  %v91_v37 = vor.u32 8388608, %v90_v34 }
  0xba   :  { %v93_v35 = vadd.s32 1, %v204_v33  ;;  %v131_v45 = vshll.u32 %v91_v37, 8 }
  0xbc   :  { %vm94_vm0 = vcmp.gt.s32.totalorder %v93_v35, 0 }
  0xbd   :  { %v95_v36 = vsel %vm94_vm0, %v93_v35, 0 }
  0xbe   :  { %v97_v38 = vand.u32 31, %v95_v36  ;;  %v96_v39 = vshrl.u32 %v95_v36, 5 }
  0xc0   :  { %v98_v40 = vsub.s32 32, %v97_v38  ;;  %v109_v42 = vshll.u32 %v312_v41, %v97_v38  ;;  %v112_v44 = vshll.u32 %v313_v43, %v97_v38  ;;  %v100_v50 = vshll.u32 %v315_v49, %v97_v38 }
  0xc1   :  { %v103_v53 = vshll.u32 %v316_v51, %v97_v38  ;;  %v106_v56 = vshll.u32 %v317_v54, %v97_v38  ;;  %vm118_vm1 = vcmp.lt.s32.totalorder %v96_v39, 4  ;;  %vm115_vm2 = vcmp.lt.s32.totalorder %v96_v39, 1 }
  0xc2   :  { %v110_v46 = vshrl.u32 %v313_v43, %v98_v40  ;;  %v113_v48 = vshrl.u32 %v314_v47, %v98_v40  ;;  %v101_v52 = vshrl.u32 %v316_v51, %v98_v40  ;;  %v104_v55 = vshrl.u32 %v317_v54, %v98_v40 }
  0xc3   :  { %v107_v57 = vshrl.u32 %v312_v41, %v98_v40  ;;  %v99_v61 = vshrl.u32 %v315_v49, %v98_v40  ;;  %vm116_vm3 = vcmp.lt.s32.totalorder %v96_v39, 2  ;;  %vm117_vm4 = vcmp.lt.s32.totalorder %v96_v39, 3 }
  0xc4   :  { %v111_v58 = vor.u32 %v110_v46, %v109_v42  ;;  %v114_v59 = vor.u32 %v113_v48, %v112_v44  ;;  %v102_v60 = vor.u32 %v101_v52, %v100_v50  ;;  %v105_v62 = vor.u32 %v104_v55, %v103_v53 }
  0xc5   :  { %v108_v63 = vor.u32 %v107_v57, %v106_v56 }
  0xc6   :  { %v124_v0 = vsel %vm118_vm1, %v111_v58, 920167782  ;;  %v128_v1 = vsel %vm118_vm1, %v114_v59, 1326507024  ;;  %v123_v3 = vsel %vm115_vm2, %v102_v60, %v105_v62  ;;  %v119_v6 = vsel %vm115_vm2, %v99_v61, %v102_v60 }
  0xc7   :  { %v120_v2 = vsel %vm118_vm1, %v108_v63, 2102212464  ;;  %v125_v4 = vsel %vm117_vm4, %v108_v63, %v124_v0  ;;  %v127_v5 = vsel %vm115_vm2, %v105_v62, %v108_v63  ;;  %v129_v9 = vsel %vm117_vm4, %v111_v58, %v128_v1 }
  0xc8   :  { %v121_v7 = vsel %vm117_vm4, %v105_v62, %v120_v2  ;;  %v126_v8 = vsel %vm116_vm3, %v123_v3, %v125_v4  ;;  %v130_v10 = vsel %vm116_vm3, %v127_v5, %v129_v9 }
  0xc9   :  { %v364_v11 = vmul.u32.u64.low %v131_v45, %v126_v8  ;;  %v365_v12 = vmul.u32.u64.high %v131_v45, %v126_v8, %v364_v11  ;;  %v367_v13 = vmul.u32.u64.low %v131_v45, %v130_v10  ;;  %v368_v14 = vmul.u32.u64.high %v131_v45, %v130_v10, %v367_v13 }
  0xca   :  { %v122_v15 = vsel %vm116_vm3, %v119_v6, %v121_v7 }
  0xcb   :  { %v141_v16 = vadd.s32 1, %v365_v12  ;;  %v138_v17 = vmul.u32 %v131_v45, %v122_v15  ;;  %vm140_vm5 = vc.u32 %v368_v14, %v364_v11  ;;  %v139_v30 = vadd.s32 %v364_v11, %v368_v14 }
  0xcd   :  { %v142_v18 = vsel %vm140_vm5, %v141_v16, %v365_v12 }
  0xce   :  { %v143_v19 = vadd.s32 %v142_v18, %v138_v17 }
  0xd0   :  { %v144_v20 = vadd.s32 536870912, %v143_v19 }
  0xd2   :  { %v145_v21 = vshrl.u32 %v144_v20, 30 }
  0xd4   :  { %v146_v22 = vshll.u32 %v145_v21, 30  ;;  %v169_v43 = vsub.s32 4, %v145_v21 }
  0xd6   :  { %v147_v23 = vsub.s32 %v143_v19, %v146_v22  ;;  %v170_v46 = vsel %vm85_vm7, %v169_v43, %v145_v21 }
  0xd7   :  { %v172_v48 = vsel %vm84_vm8, 0, %v170_v46 }
  0xd8   :  { %v149_v24 = vsub.s32 0, %v147_v23  ;;  %v176_v49 = vadd.s32 3, %v172_v48 }
  0xda   :  { %v205_v25 = vmin.u32 %v149_v24, %v147_v23  ;;  %v177_v50 = vand.u32 3, %v176_v49 }
  0xdc   :  { %v151_v26 = vclz %v205_v25  ;;  %vm182_vm9 = vcmp.eq.s32.totalorder %v177_v50, 2  ;;  %vm179_vm10 = vcmp.eq.s32.totalorder %v177_v50, 0  ;;  %vm178_vm11 = vcmp.lt.s32.totalorder %v177_v50, 2 }
  0xde   :  { %v206_v27 = vadd.s32 4294967294, %v151_v26 }
  0xe0   :  { %vm207_vm6 = vcmp.lt.s32.totalorder %v206_v27, 0 }
  0xe1   :  { %v154_v28 = vsel %vm207_vm6, 0, %v206_v27 }
  0xe2   :  { %v155_v32 = vsub.s32 32, %v154_v28  ;;  %v159_v33 = vsub.s32 4294967266, %v154_v28  ;;  %v156_v34 = vshll.u32 %v147_v23, %v154_v28 }
  0xe4   :  { %v157_v35 = vshrl.u32 %v139_v30, %v155_v32  ;;  %v160_v36 = vadd.s32 127, %v159_v33 }
  0xe6   :  { %v158_v37 = vor.u32 %v157_v35, %v156_v34  ;;  %v161_v38 = vshll.u32 %v160_v36, 23 }
  0xe8   :  { %v162_v39 = vor.u32 4788187, %v161_v38  ;;  %v165_v41 = vcvt.s32.f32 %v158_v37 }
  0xea   :  { %v163_v40 = vand.u32 2147483647, %v162_v39 }
  0xec   :  { %v166_v42 = vmul.f32 %v165_v41, %v163_v40 }
  0xee   :  { %v167_v44 = vxor.u32 2147483648, %v166_v42 }
  0xf0   :  { %v168_v45 = vsel %vm85_vm7, %v167_v44, %v166_v42 }
  0xf1   :  { %v171_v47 = vsel %vm84_vm8, %v358_v29, %v168_v45 }
  0xf2   :  { %230 = vcosq.f32 %v171_v47 }
  0xf3   :  { %232 = vsinq.f32 %v171_v47 }
  0xfc   :  { %v231_v51 = vpop.eup %230 }
  0xfd   :  { %v233_v52 = vpop.eup %232  ;;  %v183_v53 = vxor.u32 2147483648, %v231_v51 }
  0xfe   :  { %v180_v54 = vxor.u32 2147483648, %v233_v52 }
  0xff   :  { %v184_v55 = vsel %vm182_vm9, %v183_v53, %v233_v52 }
 0x100   :  { %v181_v31 = vsel %vm179_vm10, %v231_v51, %v180_v54 }
 0x101   :  { %v185_v56 = vsel %vm178_vm11, %v181_v31, %v184_v55 }
 0x102   :  { %v186_v57 = vsel %vm175_vm12, nan, %v185_v56 }
 0x103   :  { %187 = vst [vmem:[#allocation7] sm:$0x3] %v186_v57 }
 0x104   :  { %289 = shalt.err (!%p286_p6)
}
 0x105   :  { %s290_s8 = scalar_lea.hbm %s393_s2, 32 }
 0x106   :  { %p291_p7 = scmp.ne.s32.totalorder %s393_s2, %s290_s8  ;;  %p294_p8 = scmp.lt.u32.totalorder %s290_s8, %s393_s2 }
 0x108   :  { %p296_p9 = pnand %p294_p8, %p291_p7 }
 0x10a   :  { %299 = shalt.err (!%p296_p9)
}
 0x10b   :  { %197 = dma.vmem_to_hbm [thread:$0]  %s195_s4, 32, %s393_s2, [#allocation4]  }
 0x10c   :  { %304 = dma.done.wait [#allocation4], 32  }
 0x10d   :  { %305 = vsyncadd [#allocation4], 4294967264 }
 0x10e   :  { %201 = vsyncpa [#allocation3], 1 }
 0x10f   :  { %202 = vsyncpa [#allocation6], 1 }
 0x110   :  { %203 = vsyncpa [#allocation4], 1 }

</bundles_post_ra>
